<compile_context>
chip_gen: v5e
topology: v5e:2x2
jax: 0.10.0
libtpu: 0.0.40
codegen_flags: <defaults>
</compile_context>

<pallas_src>
import functools

import jax
import jax.numpy as jnp
from jax import lax
from jax.experimental import pallas as pl
from jax.experimental.pallas import tpu as pltpu


_LOWER = -0.1
_UPPER = 1.1
_EPS = 1e-6


def _softplus(x):
    # Numerically stable softplus: max(x, 0) + log1p(exp(-|x|)).
    return jnp.maximum(x, 0.0) + jnp.log1p(jnp.exp(-jnp.abs(x)))


def _hardkuma_rsample_from_inv(inv_a, inv_b, u):
    """HardKuma rsample given 1/a, 1/b and uniform noise u (clamped inside)."""
    u = jnp.clip(u, _EPS, 1.0 - _EPS)
    t = jnp.exp(jnp.log1p(-u) * inv_b)      # (1 - u)^(1/b)
    k = jnp.exp(jnp.log1p(-t) * inv_a)      # (1 - (1 - u)^(1/b))^(1/a)
    s = k * (_UPPER - _LOWER) + _LOWER      # stretch to (lower, upper)
    return jnp.clip(s, 0.0, 1.0)            # rectify


def _kuma_mask_kernel(w_ref, bias_ref, x_ref, u_ref, out_ref):
    """One tile of tokens; tokens live on the lane axis of the gates/output.

    w_ref:    (2, I)   rows = [w_a, w_b]          (VMEM-resident)
    bias_ref: (2, 1)   rows = [b_a, b_b]          (VMEM-resident)
    x_ref:    (TM, I)  token features, natural HBM layout (streamed)
    u_ref:    (1, TM)  U(0,1) reparameterization noise (streamed)
    out_ref:  (3, TM)  rows = [z, a, b]            (lane-dense output)
    """
    # (2, I) x (TM, I)^T -> (2, TM): contraction over I on the MXU; the
    # "transpose" lives inside the matmul operand, never as an HBM pass.
    gates = lax.dot_general(
        w_ref[...], x_ref[...],
        dimension_numbers=(((1,), (1,)), ((), ())),
        preferred_element_type=jnp.float32,
    ) + bias_ref[...]
    ab = _softplus(gates)                           # both gates in one pass
    a = ab[0:1, :]                                  # (1, TM)
    b = ab[1:2, :]                                  # (1, TM)
    # One reciprocal per gate, then multiplies.  (pl.reciprocal(..., approx=True)
    # is a further EUP-throughput option if a small precision loss is OK.)
    inv_a = pl.reciprocal(a, approx=False)
    inv_b = pl.reciprocal(b, approx=False)
    z = _hardkuma_rsample_from_inv(inv_a, inv_b, u_ref[...])
    # Row-slice stores: no sublane concat/relayout before the store.
    out_ref[0:1, :] = z
    out_ref[1:2, :] = a
    out_ref[2:3, :] = b


def init_params(key, insize):
    """Mirror nn.Linear(insize, 1) default init for anet / bnet."""
    scale = 1.0 / jnp.sqrt(jnp.float32(insize))
    ka, kb, kba, kbb = jax.random.split(key, 4)
    return {
        "w_a": jax.random.uniform(ka, (1, insize), jnp.float32, -scale, scale),
        "b_a": jax.random.uniform(kba, (1,), jnp.float32, -scale, scale),
        "w_b": jax.random.uniform(kb, (1, insize), jnp.float32, -scale, scale),
        "b_b": jax.random.uniform(kbb, (1,), jnp.float32, -scale, scale),
    }


@functools.partial(jax.jit, static_argnames=("tile_m",))
def kuma_mask_forward(x, u, params, *, tile_m=1024):
    """Matches KumaMask.forward(x); `u` is the U(0,1) reparameterization noise.

    Returns (z, (a, b)):
      z:    (B, T, 1) HardKuma samples (the stacked `z` of the torch module)
      a, b: (B, T, 1) per-token Kumaraswamy parameters.
    """
    B, T, I = x.shape
    M = B * T

    # Clamp the tile to the token count: tm == M is a full-dim block (so the
    # (8,128) divisibility rule never bites); otherwise tm stays a multiple of
    # 8/128 and Pallas masks the ragged tail block.
    tm = min(tile_m, M)
    grid = (pl.cdiv(M, tm),)

    # Natural layouts only; these reshapes are metadata, not HBM copies.
    x2 = x.reshape(M, I)                                   # streamed as-is (bf16 OK)
    u_row = u.astype(jnp.float32).reshape(1, M)
    w2 = jnp.concatenate([params["w_a"], params["w_b"]], axis=0).astype(x.dtype)  # (2, I)
    b2 = jnp.stack([params["b_a"][0], params["b_b"][0]]).reshape(2, 1).astype(jnp.float32)

    # Scoped-VMEM limit from the actual double-buffered footprint (+ headroom),
    # capped below v7x's 64 MiB physical VMEM.
    x_bytes = 2 * tm * I * jnp.dtype(x.dtype).itemsize      # double-buffered x tile
    io_bytes = 2 * tm * 4 + 2 * 3 * tm * 4                  # u + out double buffers
    vmem_limit = int(min(64 << 20, max(32 << 20, 2 * (x_bytes + io_bytes) + (1 << 20))))

    out = pl.pallas_call(
        _kuma_mask_kernel,
        out_shape=jax.ShapeDtypeStruct((3, M), jnp.float32),
        grid_spec=pltpu.PrefetchScalarGridSpec(
            num_scalar_prefetch=0,
            grid=grid,
            in_specs=[
                pl.BlockSpec((2, I), lambda i: (0, 0)),      # weights (resident)
                pl.BlockSpec((2, 1), lambda i: (0, 0)),      # biases  (resident)
                pl.BlockSpec((tm, I), lambda i: (i, 0)),     # x tile (natural layout)
                pl.BlockSpec((1, tm), lambda i: (0, i)),     # noise tile
            ],
            out_specs=pl.BlockSpec((3, tm), lambda i: (0, i)),
        ),
        compiler_params=pltpu.CompilerParams(
            dimension_semantics=("parallel",),               # megacore-shard token tiles
            vmem_limit_bytes=vmem_limit,
        ),
    )(w2, b2, x2, u_row)

    z = out[0].reshape(B, T, 1)
    a = out[1].reshape(B, T, 1)
    b = out[2].reshape(B, T, 1)
    # TODO(synk): z_dists in the torch module are Distribution objects with no
    # array equivalent; we return their defining (a, b) parameters instead.
    return z, (a, b)


def reference_forward(x, u, params):
    """Pure-JAX reference keeping the original per-timestep loop structure."""
    B, T, I = x.shape
    zs, az, bz = [], [], []
    for t in range(T):
        x_t = x[:, t, :].astype(jnp.float32)                       # (B, I)
        a = _softplus(x_t @ params["w_a"].T + params["b_a"])       # (B, 1)
        b = _softplus(x_t @ params["w_b"].T + params["b_b"])       # (B, 1)
        z = _hardkuma_rsample_from_inv(1.0 / a, 1.0 / b, u[:, t, :])
        zs.append(z)
        az.append(a)
        bz.append(b)
    return (jnp.stack(zs, axis=1), jnp.stack(az, axis=1), jnp.stack(bz, axis=1))


if __name__ == "__main__":
    B, T, INSIZE = 2, 8, 16

    key = jax.random.PRNGKey(0)
    kx, kp, ku = jax.random.split(key, 3)
    x = jax.random.normal(kx, (B, T, INSIZE), jnp.float32)
    params = init_params(kp, INSIZE)
    # Reparameterization noise for rsample (torch draws this from its own RNG).
    u = jnp.clip(jax.random.uniform(ku, (B, T, 1), jnp.float32),
                 1e-6, 1.0 - 1e-6)

    z, (a, b) = kuma_mask_forward(x, u, params)
    jax.block_until_ready((z, a, b))

    z_ref, a_ref, b_ref = reference_forward(x, u, params)
    assert z.shape == (B, T, 1), z.shape
    assert a.shape == (B, T, 1) and b.shape == (B, T, 1)
    assert bool(jnp.all((z >= 0.0) & (z <= 1.0)))
    assert jnp.allclose(z, z_ref, atol=1e-3, rtol=1e-3)
    assert jnp.allclose(a, a_ref, atol=1e-3, rtol=1e-3)
    assert jnp.allclose(b, b_ref, atol=1e-3, rtol=1e-3)

    print("KERNEL_OK")
</pallas_src>

<mosaic_0001>
module attributes {stable_mosaic.version = 11 : i64} {
  func.func @_kuma_mask_kernel(%arg0: i32, %arg1: memref<2x16xf32, #tpu.memory_space<vmem>>, %arg2: memref<2x1xf32, #tpu.memory_space<vmem>>, %arg3: memref<16x16xf32, #tpu.memory_space<vmem>>, %arg4: memref<1x16xf32, #tpu.memory_space<vmem>>, %arg5: memref<3x16xf32, #tpu.memory_space<vmem>>) attributes {dimension_semantics = [#tpu.dimension_semantics<parallel>], iteration_bounds = array<i64: 1>, scalar_prefetch = 0 : i64, scratch_operands = 0 : i64, tpu.core_type = #tpu.core_type<tc>, window_params = [{pipeline_mode = #tpu.pipeline_mode<synchronous>, transform_indices = @transform_0, window_bounds = array<i64: 2, 16>}, {pipeline_mode = #tpu.pipeline_mode<synchronous>, transform_indices = @transform_1, window_bounds = array<i64: 2, 1>}, {transform_indices = @transform_2, window_bounds = array<i64: 16, 16>}, {transform_indices = @transform_3, window_bounds = array<i64: 1, 16>}, {transform_indices = @transform_4, window_bounds = array<i64: 3, 16>}]} {
    %c0 = arith.constant 0 : index
    %c0_0 = arith.constant 0 : index
    %0 = vector.load %arg1[%c0, %c0_0] : memref<2x16xf32, #tpu.memory_space<vmem>>, vector<2x16xf32>
    %c0_1 = arith.constant 0 : index
    %c0_2 = arith.constant 0 : index
    %1 = vector.load %arg3[%c0_1, %c0_2] : memref<16x16xf32, #tpu.memory_space<vmem>>, vector<16x16xf32>
    %cst = arith.constant dense<0.000000e+00> : vector<2x16xf32>
    %2 = tpu.matmul %0, %1, %cst {dimension_numbers = #tpu.dot_dimension_numbers<[1], [1], [0], [0], [0, 0, 1, 0], [], []>} : vector<2x16xf32>, vector<16x16xf32>, vector<2x16xf32> -> vector<2x16xf32>
    %c0_3 = arith.constant 0 : index
    %c0_4 = arith.constant 0 : index
    %3 = vector.load %arg2[%c0_3, %c0_4] : memref<2x1xf32, #tpu.memory_space<vmem>>, vector<2x1xf32>
    %4 = vector.broadcast %3 : vector<2x1xf32> to vector<2x16xf32>
    %5 = arith.addf %2, %4 : vector<2x16xf32>
    %cst_5 = arith.constant 0.000000e+00 : f32
    %6 = vector.broadcast %cst_5 : f32 to vector<2x16xf32>
    %7 = arith.maximumf %5, %6 : vector<2x16xf32>
    %8 = math.absf %5 : vector<2x16xf32>
    %cst_6 = arith.constant 0.000000e+00 : f32
    %9 = vector.broadcast %cst_6 : f32 to vector<2x16xf32>
    %10 = arith.subf %9, %8 : vector<2x16xf32>
    %11 = math.exp %10 : vector<2x16xf32>
    %12 = math.log1p %11 : vector<2x16xf32>
    %13 = arith.addf %7, %12 : vector<2x16xf32>
    %14 = vector.extract_strided_slice %13 {offsets = [0, 0], sizes = [1, 16], strides = [1, 1]} : vector<2x16xf32> to vector<1x16xf32>
    %15 = vector.extract_strided_slice %13 {offsets = [1, 0], sizes = [1, 16], strides = [1, 1]} : vector<2x16xf32> to vector<1x16xf32>
    %16 = tpu.reciprocal %14 : vector<1x16xf32> -> vector<1x16xf32>
    %17 = tpu.reciprocal %15 : vector<1x16xf32> -> vector<1x16xf32>
    %c0_7 = arith.constant 0 : index
    %c0_8 = arith.constant 0 : index
    %18 = vector.load %arg4[%c0_7, %c0_8] : memref<1x16xf32, #tpu.memory_space<vmem>>, vector<1x16xf32>
    %cst_9 = arith.constant 9.99999997E-7 : f32
    %cst_10 = arith.constant 0.999998986 : f32
    %19 = vector.broadcast %cst_9 : f32 to vector<1x16xf32>
    %20 = arith.maximumf %19, %18 : vector<1x16xf32>
    %21 = vector.broadcast %cst_10 : f32 to vector<1x16xf32>
    %22 = arith.minimumf %21, %20 : vector<1x16xf32>
    %cst_11 = arith.constant 0.000000e+00 : f32
    %23 = vector.broadcast %cst_11 : f32 to vector<1x16xf32>
    %24 = arith.subf %23, %22 : vector<1x16xf32>
    %25 = math.log1p %24 : vector<1x16xf32>
    %26 = arith.mulf %25, %17 : vector<1x16xf32>
    %27 = math.exp %26 : vector<1x16xf32>
    %cst_12 = arith.constant 0.000000e+00 : f32
    %28 = vector.broadcast %cst_12 : f32 to vector<1x16xf32>
    %29 = arith.subf %28, %27 : vector<1x16xf32>
    %30 = math.log1p %29 : vector<1x16xf32>
    %31 = arith.mulf %30, %16 : vector<1x16xf32>
    %32 = math.exp %31 : vector<1x16xf32>
    %cst_13 = arith.constant 1.200000e+00 : f32
    %33 = vector.broadcast %cst_13 : f32 to vector<1x16xf32>
    %34 = arith.mulf %32, %33 : vector<1x16xf32>
    %cst_14 = arith.constant -1.000000e-01 : f32
    %35 = vector.broadcast %cst_14 : f32 to vector<1x16xf32>
    %36 = arith.addf %34, %35 : vector<1x16xf32>
    %cst_15 = arith.constant 0.000000e+00 : f32
    %cst_16 = arith.constant 1.000000e+00 : f32
    %37 = vector.broadcast %cst_15 : f32 to vector<1x16xf32>
    %38 = arith.maximumf %37, %36 : vector<1x16xf32>
    %39 = vector.broadcast %cst_16 : f32 to vector<1x16xf32>
    %40 = arith.minimumf %39, %38 : vector<1x16xf32>
    %c0_17 = arith.constant 0 : index
    %c0_18 = arith.constant 0 : index
    %41 = vector.load %arg5[%c0_17, %c0_18] : memref<3x16xf32, #tpu.memory_space<vmem>>, vector<1x16xf32>
    tpu.vector_store %arg5[%c0_17, %c0_18], %40 {strides = array<i32>} : memref<3x16xf32, #tpu.memory_space<vmem>>, vector<1x16xf32>,
    %c1 = arith.constant 1 : index
    %c0_19 = arith.constant 0 : index
    %42 = vector.load %arg5[%c1, %c0_19] : memref<3x16xf32, #tpu.memory_space<vmem>>, vector<1x16xf32>
    tpu.vector_store %arg5[%c1, %c0_19], %14 {strides = array<i32>} : memref<3x16xf32, #tpu.memory_space<vmem>>, vector<1x16xf32>,
    %c2 = arith.constant 2 : index
    %c0_20 = arith.constant 0 : index
    %43 = vector.load %arg5[%c2, %c0_20] : memref<3x16xf32, #tpu.memory_space<vmem>>, vector<1x16xf32>
    tpu.vector_store %arg5[%c2, %c0_20], %15 {strides = array<i32>} : memref<3x16xf32, #tpu.memory_space<vmem>>, vector<1x16xf32>,
    return
  }
  func.func @transform_0(%arg0: i32) -> (i32, i32) {
    %c0_i32 = arith.constant 0 : i32
    %c0_i32_0 = arith.constant 0 : i32
    %c0_i32_1 = arith.constant 0 : i32
    return %c0_i32, %c0_i32_0 : i32, i32
  }
  func.func @transform_1(%arg0: i32) -> (i32, i32) {
    %c0_i32 = arith.constant 0 : i32
    %c0_i32_0 = arith.constant 0 : i32
    %c0_i32_1 = arith.constant 0 : i32
    return %c0_i32, %c0_i32_0 : i32, i32
  }
  func.func @transform_2(%arg0: i32) -> (i32, i32) {
    %c0_i32 = arith.constant 0 : i32
    %c0_i32_0 = arith.constant 0 : i32
    return %arg0, %c0_i32 : i32, i32
  }
  func.func @transform_3(%arg0: i32) -> (i32, i32) {
    %c0_i32 = arith.constant 0 : i32
    %c0_i32_0 = arith.constant 0 : i32
    return %c0_i32, %arg0 : i32, i32
  }
  func.func @transform_4(%arg0: i32) -> (i32, i32) {
    %c0_i32 = arith.constant 0 : i32
    %c0_i32_0 = arith.constant 0 : i32
    return %c0_i32, %arg0 : i32, i32
  }
}

</mosaic_0001>

<bundles_post_ra>
// kernel: squeeze.5
= control target key start
LH: loop header
LB: loop body
LE: loop exit
PB: predicated region body
PF: predicated region fallthrough
CT: control target
= control target key end

     0   :  { %s80_s0 = inlined_call_operand.vmem [shape: f32[16], index: 0, kind: input, shape index: {}]   ;;  %s81_s1 = inlined_call_operand.hbm [shape: f32[2,8,1], index: 1, kind: output, shape index: {}]  }
   0x1   :  { %v5_v0 = vld [vmem:[%s80_s0] sm:$0x1] }
   0x2   :  { %2 = vsyncpa [#allocation1], 0  ;;  %6 = vst [vmem:[#allocation3] sm:$0x1] %v5_v0  ;;  %vm8_vm0 = vcmask 64512   ;;  %s62_s0 = smov 120  }
   0x3   :  { %s63_s8 = smov [#allocation0]   ;;  %s27_s1 = sshll.u32 %s81_s1, 4  ;;  %s28_s1 = int_to_ptr.hbm [resolvable:$true] %s27_s1 }
   0x4   :  { %s25_s9 = sshll.u32 %s63_s8, 4  ;;  %s26_s9 = int_to_ptr.vmem [resolvable:$true] %s25_s9 }
   0x9   :  { %v10_v1 = vld [vmem:[#allocation3] sm:$0x1]  }
   0xa   :  { %v7_v2 = vld [vmem:[#allocation3] sm:$0x1]   ;;  %11 = vrot.lane.b32.xlu0 %v10_v1, %s62_s0 }
   0xb   :  { %9 = vst.msk [vmem:[#allocation2] sm:$0x1] %vm8_vm0, %v7_v2  }
  0x7c   :  { %v12_v3 = vpop.permute.xlu0 %11  }
  0x7d   :  { %15 = vst.msk [vmem:[#allocation2 + $0x1] sm:$0x1] %vm8_vm0, %v12_v3  }
  0x84   :  { %v18_v4 = vld [vmem:[#allocation2] sm:$0x3] }
  0x85   :  { %21 = vst [vmem:[#allocation0] sm:$0x3] %v18_v4 }
  0x86   :  { %30 = dma.vmem_to_hbm [thread:$0]  %s26_s9, 32, %s28_s1, [#allocation1]  }
  0x87   :  { %60 = dma.done.wait [#allocation1], 32  }
  0x88   :  { %61 = vsyncadd [#allocation1], 4294967264 }
  0x89   :  { %33 = vsyncpa [#allocation1], 1 }

// kernel: kuma_mask_forward.1
= control target key start
LH: loop header
LB: loop body
LE: loop exit
PB: predicated region body
PF: predicated region fallthrough
CT: control target
= control target key end

     0   :  { %9 = vsyncpa [#allocation3], 0  ;;  %s197_s18 = smov [#allocation2]   ;;  %s198_s20 = smov 128   ;;  %s249_s0 = inlined_call_operand.vmem [shape: f32[2,16], index: 0, kind: input, shape index: {}]   ;;  %s250_s1 = inlined_call_operand.vmem [shape: f32[2,1], index: 1, kind: input, shape index: {}]   ;;  %s251_s2 = inlined_call_operand.hbm [shape: f32[16,16], index: 2, kind: input, shape index: {}]   ;;  %s252_s3 = inlined_call_operand.vmem [shape: f32[1,16], index: 3, kind: input, shape index: {}]   ;;  %s253_s4 = inlined_call_operand.vmem [shape: f32[3,16], index: 4, kind: output, shape index: {}]  }
   0x1   :  { %s18_s17 = sshll.u32 %s251_s2, 4  ;;  %s20_s19 = sshll.u32 %s197_s18, 4  ;;  %s19_s17 = int_to_ptr.hbm [resolvable:$true] %s18_s17  ;;  %s21_s19 = int_to_ptr.vmem [resolvable:$true] %s20_s19 }
   0x2   :  { %s199_s21 = smov 8  }
   0x3   :  { %26 = dma.hbm_to_vmem [thread:$0]  %s19_s17, 256, %s21_s19, [#allocation3], %s198_s20, %s198_s20, %s199_s21  }
   0x4   :  { %195 = dma.done.wait [#allocation3], 256  }
   0x5   :  { %196 = vsyncadd [#allocation3], 4294967040  ;;  %v200_v0 = vmov 0   ;;  %vm42_vm0 = vcmask 130048   ;;  %v35_v1 = vld [vmem:[#allocation2 + $0x8] sm:$0xff]  ;;  %v34_v3 = vld [vmem:[#allocation2] sm:$0xff] }
   0x6   :  { %156 = vset.pattern.permute.xlu0 %v200_v0  ;;  %149 = vmatpush.xpose.msk.msra.mxu0 %vm42_vm0, %v35_v1  ;;  %v36_v2 = vld [vmem:[%s250_s1] sm:$0x3]  ;;  %vm139_vm2 = vcmask 122880   ;;  %vm142_vm3 = vcmask 123905  }
   0x7   :  { %39 = vperm.xlu0 %156, %v36_v2   ;;  %v33_v4 = vld [vmem:[%s249_s0] sm:$0x3] }
   0x8   :  { %v101_v14 = vld [vmem:[%s252_s3] sm:$0x1] }
   0x9   :  { %v102_v17 = vmax.f32 %v101_v14, 1e-06 }
   0xa   :  { %150 = vmatpush.xpose.msk.msra.mxu0 %vm42_vm0, %v34_v3 }
   0xb   :  { %v103_v23 = vmin.f32 %v102_v17, 0.999999 }
   0xd   :  { %151 = vmatmul.msk.f32.vlgmr.msra.gmra.mxu0 %vm42_vm0, %v33_v4  ;;  %v104_v25 = vsub.f32 0.0, %v103_v23 }
   0xf   :  { %v105_v26 = vadd.f32 1.0, %v104_v25  ;;  %v108_v31 = vmul.f32 -0.5, %v104_v25  ;;  %v111_v39 = vand.u32 2147483647, %v104_v25 }
  0x11   :  { %v109_v36 = vadd.f32 1.0, %v108_v31  ;;  %vm112_vm8 = vcmp.lt.f32.partialorder %v111_v39, 0.0004427343 }
  0x13   :  { %v110_v42 = vmul.f32 %v109_v36, %v104_v25 }
  0x79   :  { %v40_v5 = vpop.permute.xlu0 %39 }
  0x8a   :  { %v69_v6 = vpop.f32.mrf.mxu0 }
  0x8b   :  { %v70_v7 = vadd.f32 %v69_v6, %v40_v5 }
  0x8d   :  { %v73_v8 = vand.u32 2147483647, %v70_v7  ;;  %v72_v21 = vmax.f32 %v70_v7, 0.0 }
  0x8f   :  { %v74_v9 = vsub.f32 0.0, %v73_v8 }
  0x91   :  { %v75_v10 = vmul.f32 1.442695, %v74_v9 }
  0x93   :  { %157 = vpow2.f32 %v75_v10 }
  0x99   :  { %v158_v11 = vpop.eup %157 }
  0x9a   :  { %v77_v12 = vadd.f32 1.0, %v158_v11  ;;  %v80_v13 = vmul.f32 -0.5, %v158_v11  ;;  %v83_v16 = vand.u32 2147483647, %v158_v11 }
  0x9c   :  { %159 = vlog2.f32 %v77_v12  ;;  %v81_v15 = vadd.f32 1.0, %v80_v13  ;;  %vm84_vm1 = vcmp.lt.f32.partialorder %v83_v16, 0.0004427343 }
  0x9e   :  { %v82_v20 = vmul.f32 %v158_v11, %v81_v15 }
  0xa2   :  { %v160_v18 = vpop.eup %159 }
  0xa3   :  { %v79_v19 = vmul.f32 0.6931472, %v160_v18 }
  0xa5   :  { %v85_v22 = vsel %vm84_vm1, %v82_v20, %v79_v19 }
  0xa6   :  { %v86_v24 = vadd.f32 %v85_v22, %v72_v21 }
  0xa8   :  { %161 = vrcp.f32 %v86_v24  ;;  %141 = vst.msk [vmem:[%s253_s4 + $0x1] sm:$0x1] %vm139_vm2, %v86_v24  ;;  %v98_v30 = vand.u32 2147483648, %v86_v24  ;;  %v96_v33 = vand.u32 2147483647, %v86_v24  ;;  %vm92_vm5 = vweird.f32 %v86_v24 }
  0xa9   :  { %143 = vst.msk [vmem:[%s253_s4 + $0x1] sm:$0x2] %vm142_vm3, %v86_v24  ;;  %163 = vlog2.f32 %v105_v26 }
  0xaa   :  { %v99_v35 = vor.u32 1.1754944e-38, %v98_v30  ;;  %vm97_vm7 = vcmp.eq.f32.partialorder %v96_v33, 8.507059e+37 }
  0xae   :  { %v162_v27 = vpop.eup %161 }
  0xaf   :  { %v88_v28 = vmul.f32 %v162_v27, %v86_v24  ;;  %vm93_vm4 = vweird.f32 %v162_v27  ;;  %v164_v37 = vpop.eup %163 }
  0xb0   :  { %vm94_vm6 = vmor %vm92_vm5, %vm93_vm4  ;;  %v107_v41 = vmul.f32 0.6931472, %v164_v37 }
  0xb1   :  { %v89_v29 = vsub.f32 1.0, %v88_v28 }
  0xb2   :  { %v113_v43 = vsel %vm112_vm8, %v110_v42, %v107_v41 }
  0xb3   :  { %v90_v32 = vmul.f32 %v162_v27, %v89_v29 }
  0xb5   :  { %v91_v34 = vadd.f32 %v162_v27, %v90_v32 }
  0xb7   :  { %v95_v38 = vsel %vm94_vm6, %v162_v27, %v91_v34 }
  0xb8   :  { %v100_v40 = vsel %vm97_vm7, %v99_v35, %v95_v38 }
  0xb9   :  { %115 = vst [vmem:[#allocation1] sm:$0xff] %v100_v40 }
  0xc0   :  { %v117_v44 = vld [vmem:[#allocation1 + $0x1] ss:$9 sm:$0xff] }
  0xc1   :  { %v119_v45 = vmul.f32 %v117_v44, %v113_v43 }
  0xc3   :  { %v120_v46 = vmul.f32 1.442695, %v119_v45 }
  0xc5   :  { %165 = vpow2.f32 %v120_v46 }
  0xcb   :  { %v166_v47 = vpop.eup %165 }
  0xcc   :  { %v122_v48 = vsub.f32 0.0, %v166_v47 }
  0xce   :  { %v123_v49 = vadd.f32 1.0, %v122_v48  ;;  %v126_v50 = vmul.f32 -0.5, %v122_v48  ;;  %v129_v52 = vand.u32 2147483647, %v122_v48 }
  0xd0   :  { %167 = vlog2.f32 %v123_v49  ;;  %v127_v51 = vadd.f32 1.0, %v126_v50  ;;  %vm130_vm9 = vcmp.lt.f32.partialorder %v129_v52, 0.0004427343 }
  0xd2   :  { %v128_v55 = vmul.f32 %v127_v51, %v122_v48 }
  0xd6   :  { %v168_v53 = vpop.eup %167 }
  0xd7   :  { %v125_v54 = vmul.f32 0.6931472, %v168_v53 }
  0xd9   :  { %v131_v56 = vsel %vm130_vm9, %v128_v55, %v125_v54 }
  0xda   :  { %v132_v57 = vmul.f32 %v131_v56, %v100_v40 }
  0xdc   :  { %v133_v58 = vmul.f32 1.442695, %v132_v57 }
  0xde   :  { %169 = vpow2.f32 %v133_v58 }
  0xe4   :  { %v170_v59 = vpop.eup %169 }
  0xe5   :  { %v135_v60 = vmul.f32 1.2, %v170_v59 }
  0xe7   :  { %v136_v61 = vadd.f32 -0.1, %v135_v60 }
  0xe9   :  { %v137_v62 = vmax.f32 %v136_v61, 0.0 }
  0xeb   :  { %v138_v63 = vmin.f32 %v137_v62, 1.0 }
  0xed   :  { %140 = vst.msk [vmem:[%s253_s4] sm:$0x1] %vm139_vm2, %v138_v63 }
  0xee   :  { %148 = vsyncpa [#allocation3], 1 }

</bundles_post_ra>
